<compile_context>
chip_gen: v5e
topology: v5e:2x2
jax: 0.10.0
libtpu: 0.0.40
codegen_flags: <defaults>
</compile_context>

<pallas_src>
import jax
import jax.numpy as jnp
from jax import lax
from jax.experimental import pallas as pl
from jax.experimental.pallas import tpu as pltpu


# ---------------------------------------------------------------------------
# Pallas kernel: fused 3-layer MLP forward, transposed orientation.
#   h1 = relu(W1 @ x^T + b1)            (128, tb)  -- MXU (NT matmul on the x tile)
#   h2 = relu(W2 @ h1 + b2)             (64,  tb)  -- MXU
#   y  = sum(w3_col * h2, axis=0) + b3  (1,   tb)  -- VPU mul + XLU sublane reduce
# Batch lives on the lane axis, so the output store is lane-dense.
# ---------------------------------------------------------------------------
def ngu_forward_kernel(x_ref, w1_ref, b1_ref, w2_ref, b2_ref, w3_ref, b3_ref, o_ref):
    # Cast x in-kernel (VPU, rides in slack) so the wrapper never rewrites x in HBM.
    x = x_ref[...].astype(w1_ref.dtype)                              # (tb, sd)

    # Layer 1: contract W1's in-dim with x's feature dim -> (128, tb).
    h1 = lax.dot_general(
        w1_ref[...], x,
        dimension_numbers=(((1,), (1,)), ((), ())),
        preferred_element_type=jnp.float32)                          # (128, tb) f32
    h1 = jnp.maximum(h1 + b1_ref[...], 0.0)                          # bias (128,1) broadcast
    h1 = h1.astype(w2_ref.dtype)                                     # bf16 path: re-narrow

    # Layer 2: (64, 128) @ (128, tb) -> (64, tb).
    h2 = jnp.dot(w2_ref[...], h1, preferred_element_type=jnp.float32)
    h2 = jnp.maximum(h2 + b2_ref[...], 0.0)                          # (64, tb) f32

    # Layer 3 (out_features == 1): VPU multiply + sublane reduction, no MXU pass.
    y = jnp.sum(h2 * w3_ref[...], axis=0, keepdims=True) + b3_ref[0]
    o_ref[...] = y.astype(o_ref.dtype)


def _round_up(v, m):
    return ((v + m - 1) // m) * m


def ngu_forward(x, w1, b1, w2, b2, w3, b3, *, tb=None, param_dtype="auto"):
    """Fused NGU.forward.

    x:  (B, state_dim) float32
    w1: (128, state_dim), b1: (128,)   -- native nn.Linear (out_features, in_features)
    w2: (64, 128),        b2: (64,)
    w3: (1, 64),          b3: (1,)
    Returns (B, 1) float32.

    param_dtype: "auto" (bf16 matmul inputs when B >= 4096, else f32), or an explicit
    dtype (e.g. jnp.bfloat16 / jnp.float32).  Accumulation & biases stay f32.
    """
    B, state_dim = x.shape
    h1_dim, h2_dim = w1.shape[0], w2.shape[0]
    assert w1.shape == (h1_dim, state_dim)
    assert w2.shape == (h2_dim, h1_dim)
    assert w3.shape == (1, h2_dim)

    if param_dtype == "auto":
        param_dtype = jnp.bfloat16 if B >= 4096 else jnp.float32
    elif param_dtype is None:
        param_dtype = jnp.float32

    # Batch tile: multiple of 256 (MXU-aligned), capped at 4096; ceil(B/2) keeps the
    # grid length >= 2 for moderate/large batches (v7x megacore sharding).
    if tb is None:
        tb = int(min(4096, _round_up((B + 1) // 2, 256)))
    assert tb % 128 == 0, "batch tile must be a multiple of 128 (lane/MXU alignment)"
    num_tiles = int(pl.cdiv(B, tb))

    # Only the (tiny) matmul weights are cast in the wrapper; x is cast in-kernel.
    w1m = w1.astype(param_dtype)
    w2m = w2.astype(param_dtype)
    # Column/scalar layouts for the transposed-orientation kernel (all f32).
    b1c = b1.reshape(h1_dim, 1).astype(jnp.float32)
    b2c = b2.reshape(h2_dim, 1).astype(jnp.float32)
    w3c = w3.reshape(h2_dim, 1).astype(jnp.float32)
    b3c = b3.reshape(1).astype(jnp.float32)

    out = pl.pallas_call(
        ngu_forward_kernel,
        out_shape=jax.ShapeDtypeStruct((1, B), jnp.float32),
        grid_spec=pltpu.PrefetchScalarGridSpec(
            num_scalar_prefetch=0,
            grid=(num_tiles,),
            in_specs=[
                pl.BlockSpec((tb, state_dim), lambda i: (i, 0)),      # x batch tile (edge-padded)
                pl.BlockSpec((h1_dim, state_dim), lambda i: (0, 0)),  # W1 (VMEM-resident)
                pl.BlockSpec((h1_dim, 1), lambda i: (0, 0)),          # b1
                pl.BlockSpec((h2_dim, h1_dim), lambda i: (0, 0)),     # W2
                pl.BlockSpec((h2_dim, 1), lambda i: (0, 0)),          # b2
                pl.BlockSpec((h2_dim, 1), lambda i: (0, 0)),          # w3 column
                pl.BlockSpec(memory_space=pltpu.MemorySpace.SMEM),    # b3 scalar in SMEM
            ],
            out_specs=pl.BlockSpec((1, tb), lambda i: (0, i)),        # lane-dense output row
        ),
        compiler_params=pltpu.CompilerParams(
            dimension_semantics=("parallel",),
        ),
    )(x, w1m, b1c, w2m, b2c, w3c, b3c)

    # Layout plumbing only: (1, B) -> (B, 1).
    return out[0][:, None]


# ---------------------------------------------------------------------------
# Deterministic parameter init, mimicking nn.Linear defaults:
#   W ~ U(-1/sqrt(fan_in), 1/sqrt(fan_in)), stored as (out, in); b ~ same bound.
# ---------------------------------------------------------------------------
def init_linear(key, fan_in, fan_out):
    kw, kb = jax.random.split(key)
    bound = 1.0 / jnp.sqrt(jnp.float32(fan_in))
    w = jax.random.uniform(kw, (fan_out, fan_in), jnp.float32, -bound, bound)
    b = jax.random.uniform(kb, (fan_out,), jnp.float32, -bound, bound)
    return w, b


if __name__ == "__main__":
    # Shapes consistent with NGU(state_dim, action_dim, feature_dim, ...).forward:
    # only f1/f2/f3 are used by forward().
    state_dim, action_dim, feature_dim = 32, 4, 16

    root = jax.random.PRNGKey(0)
    keys = jax.random.split(root, 8)

    w1, b1 = init_linear(keys[0], state_dim, 128)   # f1
    w2, b2 = init_linear(keys[1], 128, 64)          # f2
    w3, b3 = init_linear(keys[2], 64, 1)            # f3

    def ref_forward(xx):  # pure-JAX reference, same math as the torch forward()
        h = jnp.maximum(xx @ w1.T + b1, 0.0)
        h = jnp.maximum(h @ w2.T + b2, 0.0)
        return h @ w3.T + b3

    # Case 1: tiny batch -> single partial edge block (no wrapper pad), f32 path.
    x1 = jax.random.normal(keys[4], (16, state_dim), jnp.float32)
    out1 = jax.block_until_ready(ngu_forward(x1, w1, b1, w2, b2, w3, b3))
    assert out1.shape == (16, 1)
    assert jnp.allclose(out1, ref_forward(x1), atol=1e-5, rtol=1e-5)

    # Case 2: non-divisible batch -> 2 grid steps (megacore) + masked edge block, f32 path.
    x2 = jax.random.normal(keys[5], (300, state_dim), jnp.float32)
    out2 = jax.block_until_ready(ngu_forward(x2, w1, b1, w2, b2, w3, b3))
    assert out2.shape == (300, 1)
    assert jnp.allclose(out2, ref_forward(x2), atol=1e-5, rtol=1e-5)

    # Case 3: explicit bf16 matmul inputs (x cast in-kernel), f32 accumulation.
    out3 = jax.block_until_ready(
        ngu_forward(x2, w1, b1, w2, b2, w3, b3, tb=256, param_dtype=jnp.bfloat16))
    assert out3.shape == (300, 1)
    assert jnp.allclose(out3, ref_forward(x2), atol=5e-2, rtol=5e-2)

    # Case 4: batch large enough to trigger the auto-bf16 path + fat (>=2) tiles + edge block.
    x4 = jax.random.normal(keys[6], (4500, state_dim), jnp.float32)
    out4 = jax.block_until_ready(ngu_forward(x4, w1, b1, w2, b2, w3, b3))
    assert out4.shape == (4500, 1)
    assert jnp.allclose(out4, ref_forward(x4), atol=1e-1, rtol=1e-1)

    print("KERNEL_OK")
</pallas_src>

<mosaic_0001>
module attributes {stable_mosaic.version = 11 : i64} {
  func.func @ngu_forward_kernel(%arg0: i32, %arg1: memref<256x32xf32, #tpu.memory_space<vmem>>, %arg2: memref<128x32xf32, #tpu.memory_space<vmem>>, %arg3: memref<128x1xf32, #tpu.memory_space<vmem>>, %arg4: memref<64x128xf32, #tpu.memory_space<vmem>>, %arg5: memref<64x1xf32, #tpu.memory_space<vmem>>, %arg6: memref<64x1xf32, #tpu.memory_space<vmem>>, %arg7: memref<1xf32, #tpu.memory_space<smem>>, %arg8: memref<1x256xf32, #tpu.memory_space<vmem>>) attributes {dimension_semantics = [#tpu.dimension_semantics<parallel>], iteration_bounds = array<i64: 1>, scalar_prefetch = 0 : i64, scratch_operands = 0 : i64, tpu.core_type = #tpu.core_type<tc>, window_params = [{transform_indices = @transform_0, window_bounds = array<i64: 256, 32>}, {pipeline_mode = #tpu.pipeline_mode<synchronous>, transform_indices = @transform_1, window_bounds = array<i64: 128, 32>}, {pipeline_mode = #tpu.pipeline_mode<synchronous>, transform_indices = @transform_2, window_bounds = array<i64: 128, 1>}, {pipeline_mode = #tpu.pipeline_mode<synchronous>, transform_indices = @transform_3, window_bounds = array<i64: 64, 128>}, {pipeline_mode = #tpu.pipeline_mode<synchronous>, transform_indices = @transform_4, window_bounds = array<i64: 64, 1>}, {pipeline_mode = #tpu.pipeline_mode<synchronous>, transform_indices = @transform_5, window_bounds = array<i64: 64, 1>}, {transform_indices = @transform_6, window_bounds = array<i64: 1>}, {transform_indices = @transform_7, window_bounds = array<i64: 1, 256>}]} {
    %c0 = arith.constant 0 : index
    %c0_0 = arith.constant 0 : index
    %0 = vector.load %arg1[%c0, %c0_0] : memref<256x32xf32, #tpu.memory_space<vmem>>, vector<256x32xf32>
    %c0_1 = arith.constant 0 : index
    %c0_2 = arith.constant 0 : index
    %1 = vector.load %arg2[%c0_1, %c0_2] : memref<128x32xf32, #tpu.memory_space<vmem>>, vector<128x32xf32>
    %cst = arith.constant dense<0.000000e+00> : vector<128x256xf32>
    %2 = tpu.matmul %1, %0, %cst {dimension_numbers = #tpu.dot_dimension_numbers<[1], [1], [0], [0], [0, 0, 1, 0], [], []>} : vector<128x32xf32>, vector<256x32xf32>, vector<128x256xf32> -> vector<128x256xf32>
    %c0_3 = arith.constant 0 : index
    %c0_4 = arith.constant 0 : index
    %3 = vector.load %arg3[%c0_3, %c0_4] : memref<128x1xf32, #tpu.memory_space<vmem>>, vector<128x1xf32>
    %4 = vector.broadcast %3 : vector<128x1xf32> to vector<128x256xf32>
    %5 = arith.addf %2, %4 : vector<128x256xf32>
    %cst_5 = arith.constant 0.000000e+00 : f32
    %6 = vector.broadcast %cst_5 : f32 to vector<128x256xf32>
    %7 = arith.maximumf %5, %6 : vector<128x256xf32>
    %c0_6 = arith.constant 0 : index
    %c0_7 = arith.constant 0 : index
    %8 = vector.load %arg4[%c0_6, %c0_7] : memref<64x128xf32, #tpu.memory_space<vmem>>, vector<64x128xf32>
    %cst_8 = arith.constant dense<0.000000e+00> : vector<64x256xf32>
    %9 = tpu.matmul %8, %7, %cst_8 {dimension_numbers = #tpu.dot_dimension_numbers<[1], [0], [0], [1], [0, 0, 1, 1], [], []>} : vector<64x128xf32>, vector<128x256xf32>, vector<64x256xf32> -> vector<64x256xf32>
    %c0_9 = arith.constant 0 : index
    %c0_10 = arith.constant 0 : index
    %10 = vector.load %arg5[%c0_9, %c0_10] : memref<64x1xf32, #tpu.memory_space<vmem>>, vector<64x1xf32>
    %11 = vector.broadcast %10 : vector<64x1xf32> to vector<64x256xf32>
    %12 = arith.addf %9, %11 : vector<64x256xf32>
    %cst_11 = arith.constant 0.000000e+00 : f32
    %13 = vector.broadcast %cst_11 : f32 to vector<64x256xf32>
    %14 = arith.maximumf %12, %13 : vector<64x256xf32>
    %c0_12 = arith.constant 0 : index
    %c0_13 = arith.constant 0 : index
    %15 = vector.load %arg6[%c0_12, %c0_13] : memref<64x1xf32, #tpu.memory_space<vmem>>, vector<64x1xf32>
    %16 = vector.broadcast %15 : vector<64x1xf32> to vector<64x256xf32>
    %17 = arith.mulf %14, %16 : vector<64x256xf32>
    %cst_14 = arith.constant dense<0.000000e+00> : vector<256xf32>
    %18 = vector.multi_reduction <add>, %17, %cst_14 [0] : vector<64x256xf32> to vector<256xf32>
    %19 = vector.shape_cast %18 : vector<256xf32> to vector<1x256xf32>
    %c0_15 = arith.constant 0 : index
    %20 = memref.load %arg7[%c0_15] : memref<1xf32, #tpu.memory_space<smem>>
    %21 = vector.broadcast %20 : f32 to vector<1x256xf32>
    %22 = arith.addf %19, %21 : vector<1x256xf32>
    %c0_16 = arith.constant 0 : index
    %c0_17 = arith.constant 0 : index
    %23 = vector.load %arg8[%c0_16, %c0_17] : memref<1x256xf32, #tpu.memory_space<vmem>>, vector<1x256xf32>
    tpu.vector_store %arg8[%c0_16, %c0_17], %22 {strides = array<i32>} : memref<1x256xf32, #tpu.memory_space<vmem>>, vector<1x256xf32>,
    return
  }
  func.func @transform_0(%arg0: i32) -> (i32, i32) {
    %c0_i32 = arith.constant 0 : i32
    %c0_i32_0 = arith.constant 0 : i32
    return %arg0, %c0_i32 : i32, i32
  }
  func.func @transform_1(%arg0: i32) -> (i32, i32) {
    %c0_i32 = arith.constant 0 : i32
    %c0_i32_0 = arith.constant 0 : i32
    %c0_i32_1 = arith.constant 0 : i32
    return %c0_i32, %c0_i32_0 : i32, i32
  }
  func.func @transform_2(%arg0: i32) -> (i32, i32) {
    %c0_i32 = arith.constant 0 : i32
    %c0_i32_0 = arith.constant 0 : i32
    %c0_i32_1 = arith.constant 0 : i32
    return %c0_i32, %c0_i32_0 : i32, i32
  }
  func.func @transform_3(%arg0: i32) -> (i32, i32) {
    %c0_i32 = arith.constant 0 : i32
    %c0_i32_0 = arith.constant 0 : i32
    %c0_i32_1 = arith.constant 0 : i32
    return %c0_i32, %c0_i32_0 : i32, i32
  }
  func.func @transform_4(%arg0: i32) -> (i32, i32) {
    %c0_i32 = arith.constant 0 : i32
    %c0_i32_0 = arith.constant 0 : i32
    %c0_i32_1 = arith.constant 0 : i32
    return %c0_i32, %c0_i32_0 : i32, i32
  }
  func.func @transform_5(%arg0: i32) -> (i32, i32) {
    %c0_i32 = arith.constant 0 : i32
    %c0_i32_0 = arith.constant 0 : i32
    %c0_i32_1 = arith.constant 0 : i32
    return %c0_i32, %c0_i32_0 : i32, i32
  }
  func.func @transform_6(%arg0: i32) -> i32 {
    %c0_i32 = arith.constant 0 : i32
    %c0_i32_0 = arith.constant 0 : i32
    return %c0_i32 : i32
  }
  func.func @transform_7(%arg0: i32) -> (i32, i32) {
    %c0_i32 = arith.constant 0 : i32
    %c0_i32_0 = arith.constant 0 : i32
    return %c0_i32, %arg0 : i32, i32
  }
}

</mosaic_0001>

<bundles_post_ra>
// kernel: tpu_custom_call.1
= control target key start
LH: loop header
LB: loop body
LE: loop exit
PB: predicated region body
PF: predicated region fallthrough
CT: control target
= control target key end

     0   :  { %13 = vsyncpa [#allocation4], 0  ;;  %vm172_vm0 = vcmask 261120   ;;  %v881_v4 = vmov 0   ;;  %vm730_vm1 = vcmask 1040384   ;;  %s1319_s0 = inlined_call_operand.vmem [shape: f32[16,32], index: 0, kind: input, shape index: {}]   ;;  %s1320_s1 = inlined_call_operand.vmem [shape: f32[128,32], index: 1, kind: input, shape index: {}]   ;;  %s1321_s2 = inlined_call_operand.vmem [shape: f32[128,1], index: 2, kind: input, shape index: {}]   ;;  %s1322_s3 = inlined_call_operand.vmem [shape: f32[64,128], index: 3, kind: input, shape index: {}]   ;;  %s1323_s4 = inlined_call_operand.vmem [shape: f32[64,1], index: 4, kind: input, shape index: {}]   ;;  %s1324_s5 = inlined_call_operand.vmem [shape: f32[64,1], index: 5, kind: input, shape index: {}]   ;;  %s1325_s6 = inlined_call_operand.<no memory space> [shape: f32[1], index: 6, kind: input, shape index: {}]   ;;  %s1326_s7 = inlined_call_operand.hbm [shape: f32[1,16], index: 7, kind: output, shape index: {}]  }
   0x1   :  { %v43_v0 = vld [vmem:[%s1319_s0 + $0x78] sm:$0xff]  ;;  %v42_v2 = vld [vmem:[%s1319_s0 + $0x70] sm:$0xff]  ;;  %852 = vset.pattern.permute.xlu0 %v881_v4  ;;  %853 = vset.pattern.permute.xlu1 %v881_v4  ;;  %v41_v5 = vld [vmem:[%s1319_s0 + $0x68] sm:$0xff] }
   0x2   :  { %v59_v1 = vld [vmem:[%s1319_s0 + $0xf8] sm:$0xff]  ;;  %754 = vmatpush.xpose.msk.msra.mxu0 %vm172_vm0, %v43_v0  ;;  %v58_v3 = vld [vmem:[%s1319_s0 + $0xf0] sm:$0xff]  ;;  %818 = vmatpush.xpose.msk.msra.mxu2 %vm172_vm0, %v43_v0  ;;  %v57_v6 = vld [vmem:[%s1319_s0 + $0xe8] sm:$0xff] }
   0x3   :  { %786 = vmatpush.xpose.msk.msra.mxu1 %vm172_vm0, %v59_v1  ;;  %834 = vmatpush.xpose.msk.msra.mxu3 %vm172_vm0, %v59_v1  ;;  %v91_v7 = vld [vmem:[%s1321_s2 + $0x78] sm:$0xff]  ;;  %v40_v8 = vld [vmem:[%s1319_s0 + $0x60] sm:$0xff]  ;;  %v90_v10 = vld [vmem:[%s1321_s2 + $0x70] sm:$0xff] }
   0x4   :  { %854 = vset.pattern.permute.xlu2 %v881_v4  ;;  %169 = vperm.xlu0 %852, %v91_v7   ;;  %v56_v9 = vld [vmem:[%s1319_s0 + $0xe0] sm:$0xff]  ;;  %v39_v11 = vld [vmem:[%s1319_s0 + $0x58] sm:$0xff]  ;;  %v38_v13 = vld [vmem:[%s1319_s0 + $0x50] sm:$0xff] }
   0x5   :  { %v55_v12 = vld [vmem:[%s1319_s0 + $0xd8] sm:$0xff]  ;;  %v54_v14 = vld [vmem:[%s1319_s0 + $0xd0] sm:$0xff]  ;;  %v85_v15 = vld [vmem:[%s1321_s2 + $0x48] sm:$0xff] }
   0x6   :  { %755 = vmatpush.xpose.msk.msra.mxu0 %vm172_vm0, %v42_v2  ;;  %819 = vmatpush.xpose.msk.msra.mxu2 %vm172_vm0, %v42_v2  ;;  %v37_v16 = vld [vmem:[%s1319_s0 + $0x48] sm:$0xff]  ;;  %v36_v19 = vld [vmem:[%s1319_s0 + $0x40] sm:$0xff]  ;;  %v82_v21 = vld [vmem:[%s1321_s2 + $0x30] sm:$0xff] }
   0x7   :  { %787 = vmatpush.xpose.msk.msra.mxu1 %vm172_vm0, %v58_v3  ;;  %835 = vmatpush.xpose.msk.msra.mxu3 %vm172_vm0, %v58_v3  ;;  %v53_v17 = vld [vmem:[%s1319_s0 + $0xc8] sm:$0xff]  ;;  %v52_v20 = vld [vmem:[%s1319_s0 + $0xc0] sm:$0xff]  ;;  %v35_v22 = vld [vmem:[%s1319_s0 + $0x38] sm:$0xff] }
   0x8   :  { %v89_v18 = vld [vmem:[%s1321_s2 + $0x68] sm:$0xff]  ;;  %v51_v23 = vld [vmem:[%s1319_s0 + $0xb8] sm:$0xff]  ;;  %v88_v24 = vld [vmem:[%s1321_s2 + $0x60] sm:$0xff] }
   0x9   :  { %159 = vperm.xlu1 %853, %v89_v18   ;;  %v34_v25 = vld [vmem:[%s1319_s0 + $0x30] sm:$0xff]  ;;  %v79_v27 = vld [vmem:[%s1321_s2 + $0x18] sm:$0xff]  ;;  %v33_v28 = vld [vmem:[%s1319_s0 + $0x28] sm:$0xff] }
   0xa   :  { %756 = vmatpush.xpose.msk.msra.mxu0 %vm172_vm0, %v41_v5  ;;  %820 = vmatpush.xpose.msk.msra.mxu2 %vm172_vm0, %v41_v5  ;;  %v50_v26 = vld [vmem:[%s1319_s0 + $0xb0] sm:$0xff]  ;;  %v49_v29 = vld [vmem:[%s1319_s0 + $0xa8] sm:$0xff]  ;;  %v87_v30 = vld [vmem:[%s1321_s2 + $0x58] sm:$0xff] }
   0xb   :  { %788 = vmatpush.xpose.msk.msra.mxu1 %vm172_vm0, %v57_v6  ;;  %836 = vmatpush.xpose.msk.msra.mxu3 %vm172_vm0, %v57_v6  ;;  %v84_v31 = vld [vmem:[%s1321_s2 + $0x40] sm:$0xff]  ;;  %v31_v35 = vld [vmem:[%s1319_s0 + $0x18] sm:$0xff]  ;;  %v86_v37 = vld [vmem:[%s1321_s2 + $0x50] sm:$0xff] }
   0xc   :  { %164 = vperm.xlu0 %852, %v90_v10   ;;  %v32_v32 = vld [vmem:[%s1319_s0 + $0x20] sm:$0xff]  ;;  %149 = vperm.xlu2 %854, %v87_v30   ;;  %v47_v36 = vld [vmem:[%s1319_s0 + $0x98] sm:$0xff]  ;;  %v81_v38 = vld [vmem:[%s1321_s2 + $0x28] sm:$0xff] }
   0xd   :  { %v48_v33 = vld [vmem:[%s1319_s0 + $0xa0] sm:$0xff]  ;;  %v30_v39 = vld [vmem:[%s1319_s0 + $0x10] sm:$0xff]  ;;  %v29_v41 = vld [vmem:[%s1319_s0 + $0x8] sm:$0xff] }
   0xe   :  { %757 = vmatpush.xpose.msk.msra.mxu0 %vm172_vm0, %v40_v8  ;;  %821 = vmatpush.xpose.msk.msra.mxu2 %vm172_vm0, %v40_v8  ;;  %v76_v34 = vld [vmem:[%s1321_s2] sm:$0xff]  ;;  %v46_v40 = vld [vmem:[%s1319_s0 + $0x90] sm:$0xff]  ;;  %v45_v42 = vld [vmem:[%s1319_s0 + $0x88] sm:$0xff] }
   0xf   :  { %789 = vmatpush.xpose.msk.msra.mxu1 %vm172_vm0, %v56_v9  ;;  %837 = vmatpush.xpose.msk.msra.mxu3 %vm172_vm0, %v56_v9  ;;  %v83_v43 = vld [vmem:[%s1321_s2 + $0x38] sm:$0xff]  ;;  %v78_v44 = vld [vmem:[%s1321_s2 + $0x10] sm:$0xff]  ;;  %v28_v45 = vld [vmem:[%s1319_s0] sm:$0xff] }
  0x10   :  { %v44_v46 = vld [vmem:[%s1319_s0 + $0x80] sm:$0xff]  ;;  %v61_v50 = vld [vmem:[%s1320_s1 + $0x8] sm:$0xff]  ;;  %v62_v54 = vld [vmem:[%s1320_s1 + $0x10] sm:$0xff] }
  0x11   :  { %154 = vperm.xlu1 %853, %v88_v24   ;;  %v60_v47 = vld [vmem:[%s1320_s1] sm:$0xff]  ;;  %v73_v51 = vld [vmem:[%s1320_s1 + $0x68] sm:$0xff]  ;;  %v74_v55 = vld [vmem:[%s1320_s1 + $0x70] sm:$0xff] }
  0x12   :  { %758 = vmatpush.xpose.msk.msra.mxu0 %vm172_vm0, %v39_v11  ;;  %822 = vmatpush.xpose.msk.msra.mxu2 %vm172_vm0, %v39_v11  ;;  %v72_v48 = vld [vmem:[%s1320_s1 + $0x60] sm:$0xff]  ;;  %v77_v52 = vld [vmem:[%s1321_s2 + $0x8] sm:$0xff]  ;;  %v489_v56 = vld [vmem:[%s1323_s4 + $0x10] sm:$0xff] }
  0x13   :  { %790 = vmatpush.xpose.msk.msra.mxu1 %vm172_vm0, %v55_v12  ;;  %838 = vmatpush.xpose.msk.msra.mxu3 %vm172_vm0, %v55_v12  ;;  %v80_v49 = vld [vmem:[%s1321_s2 + $0x20] sm:$0xff]  ;;  %v490_v57 = vld [vmem:[%s1323_s4 + $0x18] sm:$0xff]  ;;  %v634_v60 = vld [vmem:[%s1324_s5 + $0x8] sm:$0xff] }
  0x14   :  { %139 = vperm.xlu0 %852, %v85_v15   ;;  %144 = vperm.xlu2 %854, %v86_v37   ;;  %v487_v53 = vld [vmem:[%s1323_s4] sm:$0xff]  ;;  %v63_v58 = vld [vmem:[%s1320_s1 + $0x18] sm:$0xff]  ;;  %v492_v63 = vld [vmem:[%s1323_s4 + $0x28] sm:$0xff] }
  0x15   :  { %v75_v59 = vld [vmem:[%s1320_s1 + $0x78] sm:$0xff]  ;;  %v491_v61 = vld [vmem:[%s1323_s4 + $0x20] sm:$0xff]  ;;  %v65_v1 = vld [vmem:[%s1320_s1 + $0x28] sm:$0xff] }
  0x16   :  { %759 = vmatpush.xpose.msk.msra.mxu0 %vm172_vm0, %v38_v13  ;;  %823 = vmatpush.xpose.msk.msra.mxu2 %vm172_vm0, %v38_v13  ;;  %v64_v62 = vld [vmem:[%s1320_s1 + $0x20] sm:$0xff]  ;;  %v636_v0 = vld [vmem:[%s1324_s5 + $0x18] sm:$0xff]  ;;  %v488_v4 = vld [vmem:[%s1323_s4 + $0x8] sm:$0xff] }
  0x17   :  { %791 = vmatpush.xpose.msk.msra.mxu1 %vm172_vm0, %v54_v14  ;;  %839 = vmatpush.xpose.msk.msra.mxu3 %vm172_vm0, %v54_v14  ;;  %v637_v2 = vld [vmem:[%s1324_s5 + $0x20] sm:$0xff]  ;;  %v494_v3 = vld [vmem:[%s1323_s4 + $0x38] sm:$0xff]  ;;  %v66_v5 = vld [vmem:[%s1320_s1 + $0x30] sm:$0xff] }
  0x18   :  { %v639_v6 = vld [vmem:[%s1324_s5 + $0x30] sm:$0xff]  ;;  %v640_v7 = vld [vmem:[%s1324_s5 + $0x38] sm:$0xff]  ;;  %v633_v8 = vld [vmem:[%s1324_s5] sm:$0xff] }
  0x19   :  { %134 = vperm.xlu1 %853, %v84_v31   ;;  %v67_v9 = vld [vmem:[%s1320_s1 + $0x38] sm:$0xff]  ;;  %v635_v10 = vld [vmem:[%s1324_s5 + $0x10] sm:$0xff]  ;;  %v68_v11 = vld [vmem:[%s1320_s1 + $0x40] sm:$0xff] }
  0x1a   :  { %760 = vmatpush.xpose.msk.msra.mxu0 %vm172_vm0, %v37_v16  ;;  %824 = vmatpush.xpose.msk.msra.mxu2 %vm172_vm0, %v37_v16  ;;  %v493_v12 = vld [vmem:[%s1323_s4 + $0x30] sm:$0xff]  ;;  %v69_v13 = vld [vmem:[%s1320_s1 + $0x48] sm:$0xff]  ;;  %v71_v16 = vld [vmem:[%s1320_s1 + $0x58] sm:$0xff] }
  0x1b   :  { %792 = vmatpush.xpose.msk.msra.mxu1 %vm172_vm0, %v53_v17  ;;  %840 = vmatpush.xpose.msk.msra.mxu3 %vm172_vm0, %v53_v17  ;;  %v638_v14 = vld [vmem:[%s1324_s5 + $0x28] sm:$0xff]  ;;  %v70_v15 = vld [vmem:[%s1320_s1 + $0x50] sm:$0xff] }
  0x1c   :  { %124 = vperm.xlu0 %852, %v82_v21   ;;  %129 = vperm.xlu2 %854, %v83_v43  }
  0x1e   :  { %761 = vmatpush.xpose.msk.msra.mxu0 %vm172_vm0, %v36_v19  ;;  %825 = vmatpush.xpose.msk.msra.mxu2 %vm172_vm0, %v36_v19 }
  0x1f   :  { %793 = vmatpush.xpose.msk.msra.mxu1 %vm172_vm0, %v52_v20  ;;  %841 = vmatpush.xpose.msk.msra.mxu3 %vm172_vm0, %v52_v20 }
  0x21   :  { %119 = vperm.xlu1 %853, %v81_v38  }
  0x22   :  { %762 = vmatpush.xpose.msk.msra.mxu0 %vm172_vm0, %v35_v22  ;;  %826 = vmatpush.xpose.msk.msra.mxu2 %vm172_vm0, %v35_v22 }
  0x23   :  { %794 = vmatpush.xpose.msk.msra.mxu1 %vm172_vm0, %v51_v23  ;;  %842 = vmatpush.xpose.msk.msra.mxu3 %vm172_vm0, %v51_v23 }
  0x24   :  { %109 = vperm.xlu0 %852, %v79_v27   ;;  %114 = vperm.xlu2 %854, %v80_v49  }
  0x26   :  { %763 = vmatpush.xpose.msk.msra.mxu0 %vm172_vm0, %v34_v25  ;;  %827 = vmatpush.xpose.msk.msra.mxu2 %vm172_vm0, %v34_v25 }
  0x27   :  { %795 = vmatpush.xpose.msk.msra.mxu1 %vm172_vm0, %v50_v26  ;;  %843 = vmatpush.xpose.msk.msra.mxu3 %vm172_vm0, %v50_v26 }
  0x29   :  { %104 = vperm.xlu1 %853, %v78_v44  }
  0x2a   :  { %764 = vmatpush.xpose.msk.msra.mxu0 %vm172_vm0, %v33_v28  ;;  %828 = vmatpush.xpose.msk.msra.mxu2 %vm172_vm0, %v33_v28 }
  0x2b   :  { %796 = vmatpush.xpose.msk.msra.mxu1 %vm172_vm0, %v49_v29  ;;  %844 = vmatpush.xpose.msk.msra.mxu3 %vm172_vm0, %v49_v29 }
  0x2c   :  { %94 = vperm.xlu0 %852, %v76_v34   ;;  %99 = vperm.xlu2 %854, %v77_v52  }
  0x2e   :  { %765 = vmatpush.xpose.msk.msra.mxu0 %vm172_vm0, %v32_v32  ;;  %829 = vmatpush.xpose.msk.msra.mxu2 %vm172_vm0, %v32_v32 }
  0x2f   :  { %797 = vmatpush.xpose.msk.msra.mxu1 %vm172_vm0, %v48_v33  ;;  %845 = vmatpush.xpose.msk.msra.mxu3 %vm172_vm0, %v48_v33 }
  0x31   :  { %497 = vperm.xlu1 %853, %v487_v53  }
  0x32   :  { %766 = vmatpush.xpose.msk.msra.mxu0 %vm172_vm0, %v31_v35  ;;  %830 = vmatpush.xpose.msk.msra.mxu2 %vm172_vm0, %v31_v35 }
  0x33   :  { %798 = vmatpush.xpose.msk.msra.mxu1 %vm172_vm0, %v47_v36  ;;  %846 = vmatpush.xpose.msk.msra.mxu3 %vm172_vm0, %v47_v36 }
  0x34   :  { %507 = vperm.xlu0 %852, %v489_v56   ;;  %502 = vperm.xlu2 %854, %v488_v4  }
  0x36   :  { %767 = vmatpush.xpose.msk.msra.mxu0 %vm172_vm0, %v30_v39  ;;  %831 = vmatpush.xpose.msk.msra.mxu2 %vm172_vm0, %v30_v39 }
  0x37   :  { %799 = vmatpush.xpose.msk.msra.mxu1 %vm172_vm0, %v46_v40  ;;  %847 = vmatpush.xpose.msk.msra.mxu3 %vm172_vm0, %v46_v40 }
  0x39   :  { %512 = vperm.xlu1 %853, %v490_v57  }
  0x3a   :  { %768 = vmatpush.xpose.msk.msra.mxu0 %vm172_vm0, %v29_v41  ;;  %832 = vmatpush.xpose.msk.msra.mxu2 %vm172_vm0, %v29_v41 }
  0x3b   :  { %800 = vmatpush.xpose.msk.msra.mxu1 %vm172_vm0, %v45_v42  ;;  %848 = vmatpush.xpose.msk.msra.mxu3 %vm172_vm0, %v45_v42 }
  0x3c   :  { %648 = vperm.xlu0 %852, %v634_v60   ;;  %643 = vperm.xlu2 %854, %v633_v8  }
  0x3e   :  { %769 = vmatpush.xpose.msk.msra.mxu0 %vm172_vm0, %v28_v45  ;;  %833 = vmatpush.xpose.msk.msra.mxu2 %vm172_vm0, %v28_v45 }
  0x3f   :  { %801 = vmatpush.xpose.msk.msra.mxu1 %vm172_vm0, %v44_v46  ;;  %849 = vmatpush.xpose.msk.msra.mxu3 %vm172_vm0, %v44_v46 }
  0x41   :  { %770 = vmatmul.msk.f32.vlgmr.msra.gmra.mxu0 %vm172_vm0, %v60_v47  ;;  %782 = vmatmul.msk.f32.vlgmr.msra.gmra.mxu2 %vm172_vm0, %v72_v48 }
  0x42   :  { %802 = vmatmul.msk.f32.vlgmr.msra.gmra.mxu1 %vm172_vm0, %v60_v47  ;;  %814 = vmatmul.msk.f32.vlgmr.msra.gmra.mxu3 %vm172_vm0, %v72_v48 }
  0x43   :  { %517 = vperm.xlu1 %853, %v491_v61  }
  0x44   :  { %522 = vperm.xlu0 %852, %v492_v63   ;;  %653 = vperm.xlu2 %854, %v635_v10  }
  0x49   :  { %771 = vmatmul.msk.f32.gmra.mxu0 %vm172_vm0, %v61_v50  ;;  %783 = vmatmul.msk.f32.gmra.mxu2 %vm172_vm0, %v73_v51 }
  0x4a   :  { %803 = vmatmul.msk.f32.gmra.mxu1 %vm172_vm0, %v61_v50  ;;  %815 = vmatmul.msk.f32.gmra.mxu3 %vm172_vm0, %v73_v51 }
  0x4b   :  { %658 = vperm.xlu1 %853, %v636_v0  }
  0x4c   :  { %663 = vperm.xlu0 %852, %v637_v2   ;;  %527 = vperm.xlu2 %854, %v493_v12  }
  0x51   :  { %772 = vmatmul.msk.f32.gmra.mxu0 %vm172_vm0, %v62_v54  ;;  %784 = vmatmul.msk.f32.gmra.mxu2 %vm172_vm0, %v74_v55 }
  0x52   :  { %804 = vmatmul.msk.f32.gmra.mxu1 %vm172_vm0, %v62_v54  ;;  %816 = vmatmul.msk.f32.gmra.mxu3 %vm172_vm0, %v74_v55 }
  0x53   :  { %532 = vperm.xlu1 %853, %v494_v3  }
  0x54   :  { %673 = vperm.xlu0 %852, %v639_v6   ;;  %668 = vperm.xlu2 %854, %v638_v14  }
  0x59   :  { %773 = vmatmul.msk.f32.gmra.mxu0 %vm172_vm0, %v63_v58  ;;  %785 = vmatmul.msk.f32.gmra.mxu2 %vm172_vm0, %v75_v59 }
  0x5a   :  { %805 = vmatmul.msk.f32.gmra.mxu1 %vm172_vm0, %v63_v58  ;;  %817 = vmatmul.msk.f32.gmra.mxu3 %vm172_vm0, %v75_v59 }
  0x5b   :  { %678 = vperm.xlu1 %853, %v640_v7  }
  0x61   :  { %774 = vmatmul.msk.f32.gmra.mxu0 %vm172_vm0, %v64_v62 }
  0x62   :  { %806 = vmatmul.msk.f32.gmra.mxu1 %vm172_vm0, %v64_v62 }
  0x66   :  { %v150_v61 = vpop.permute.xlu2 %149 }
  0x69   :  { %775 = vmatmul.msk.f32.gmra.mxu0 %vm172_vm0, %v65_v1 }
  0x6a   :  { %807 = vmatmul.msk.f32.gmra.mxu1 %vm172_vm0, %v65_v1 }
  0x6e   :  { %v145_v2 = vpop.permute.xlu2 %144 }
  0x71   :  { %776 = vmatmul.msk.f32.gmra.mxu0 %vm172_vm0, %v66_v5 }
  0x72   :  { %808 = vmatmul.msk.f32.gmra.mxu1 %vm172_vm0, %v66_v5 }
  0x76   :  { %v170_v27 = vpop.permute.xlu0 %169  ;;  %v130_v7 = vpop.permute.xlu2 %129 }
  0x79   :  { %777 = vmatmul.msk.f32.gmra.mxu0 %vm172_vm0, %v67_v9 }
  0x7a   :  { %809 = vmatmul.msk.f32.gmra.mxu1 %vm172_vm0, %v67_v9 }
  0x7b   :  { %v160_v28 = vpop.permute.xlu1 %159 }
  0x7e   :  { %v165_v33 = vpop.permute.xlu0 %164 }
  0x81   :  { %778 = vmatmul.msk.f32.gmra.mxu0 %vm172_vm0, %v68_v11 }
  0x82   :  { %810 = vmatmul.msk.f32.gmra.mxu1 %vm172_vm0, %v68_v11 }
  0x83   :  { %v155_v34 = vpop.permute.xlu1 %154 }
  0x86   :  { %v140_v3 = vpop.permute.xlu0 %139 }
  0x89   :  { %779 = vmatmul.msk.f32.gmra.mxu0 %vm172_vm0, %v69_v13 }
  0x8a   :  { %811 = vmatmul.msk.f32.gmra.mxu1 %vm172_vm0, %v69_v13 }
  0x8b   :  { %v135_v6 = vpop.permute.xlu1 %134 }
  0x8e   :  { %v125_v8 = vpop.permute.xlu0 %124 }
  0x91   :  { %780 = vmatmul.msk.f32.gmra.mxu0 %vm172_vm0, %v70_v15 }
  0x92   :  { %812 = vmatmul.msk.f32.gmra.mxu1 %vm172_vm0, %v70_v15 }
  0x99   :  { %781 = vmatmul.msk.f32.gmra.mxu0 %vm172_vm0, %v71_v16 }
  0x9a   :  { %813 = vmatmul.msk.f32.gmra.mxu1 %vm172_vm0, %v71_v16 }
  0xbe   :  { %v1259_v17 = vpop.f32.mrf.mxu0 }
  0xbf   :  { %v1261_v18 = vpop.f32.mrf.mxu1 }
  0xc4   :  { %v370_v20 = vpop.f32.mrf.mxu2 }
  0xc5   :  { %v435_v19 = vpop.f32.mrf.mxu3  ;;  %v371_v46 = vadd.f32 %v370_v20, %v155_v34 }
  0xc6   :  { %v1263_v21 = vpop.f32.mrf.mxu0  ;;  %v436_v45 = vadd.f32 %v435_v19, %v155_v34 }
  0xc7   :  { %v1265_v22 = vpop.f32.mrf.mxu1  ;;  %v471_v54 = vmax.f32 %v371_v46, 0.0 }
  0xc8   :  { %v472_v53 = vmax.f32 %v436_v45, 0.0 }
  0xcc   :  { %v373_v24 = vpop.f32.mrf.mxu2 }
  0xcd   :  { %v438_v23 = vpop.f32.mrf.mxu3  ;;  %v374_v42 = vadd.f32 %v373_v24, %v160_v28 }
  0xce   :  { %v1267_v25 = vpop.f32.mrf.mxu0  ;;  %v439_v41 = vadd.f32 %v438_v23, %v160_v28  ;;  %v120_v23 = vpop.permute.xlu1 %119 }
  0xcf   :  { %v1269_v26 = vpop.f32.mrf.mxu1  ;;  %v473_v52 = vmax.f32 %v374_v42, 0.0 }
  0xd0   :  { %v474_v51 = vmax.f32 %v439_v41, 0.0 }
  0xd4   :  { %v376_v30 = vpop.f32.mrf.mxu2 }
  0xd5   :  { %v441_v29 = vpop.f32.mrf.mxu3  ;;  %v377_v36 = vadd.f32 %v376_v30, %v165_v33  ;;  %v115_v30 = vpop.permute.xlu2 %114 }
  0xd6   :  { %v1271_v31 = vpop.f32.mrf.mxu0  ;;  %v442_v35 = vadd.f32 %v441_v29, %v165_v33 }
  0xd7   :  { %v1273_v32 = vpop.f32.mrf.mxu1  ;;  %v475_v48 = vmax.f32 %v377_v36, 0.0 }
  0xd8   :  { %v476_v47 = vmax.f32 %v442_v35, 0.0 }
  0xdc   :  { %v379_v38 = vpop.f32.mrf.mxu2 }
  0xdd   :  { %v444_v37 = vpop.f32.mrf.mxu3  ;;  %v380_v44 = vadd.f32 %v379_v38, %v170_v27 }
  0xde   :  { %v1275_v39 = vpop.f32.mrf.mxu0  ;;  %v445_v43 = vadd.f32 %v444_v37, %v170_v27  ;;  %v110_v37 = vpop.permute.xlu0 %109 }
  0xdf   :  { %v1277_v40 = vpop.f32.mrf.mxu1  ;;  %v477_v50 = vmax.f32 %v380_v44, 0.0 }
  0xe0   :  { %v478_v49 = vmax.f32 %v445_v43, 0.0 }
  0xe1   :  { %535 = vmatpush.msrb.mxu2 %v477_v50 }
  0xe2   :  { %576 = vmatpush.msrb.mxu3 %v478_v49  ;;  %v412_v49 = vadd.f32 %v1277_v40, %v115_v30 }
  0xe3   :  { %536 = vmatpush.msrb.mxu2 %v475_v48  ;;  %v347_v48 = vadd.f32 %v1275_v39, %v115_v30 }
  0xe4   :  { %577 = vmatpush.msrb.mxu3 %v476_v47  ;;  %v456_v40 = vmax.f32 %v412_v49, 0.0 }
  0xe5   :  { %537 = vmatpush.msrb.mxu2 %v473_v52  ;;  %v105_v52 = vpop.permute.xlu1 %104 }
  0xe6   :  { %v349_v55 = vpop.f32.mrf.mxu0  ;;  %578 = vmatpush.msrb.mxu3 %v474_v51  ;;  %v406_v39 = vadd.f32 %v1269_v26, %v105_v52 }
  0xe7   :  { %v414_v56 = vpop.f32.mrf.mxu1  ;;  %538 = vmatpush.msrb.mxu2 %v471_v54  ;;  %v350_v44 = vadd.f32 %v349_v55, %v120_v23  ;;  %v409_v54 = vadd.f32 %v1273_v32, %v110_v37 }
  0xe8   :  { %579 = vmatpush.msrb.mxu3 %v472_v53  ;;  %v415_v45 = vadd.f32 %v414_v56, %v120_v23  ;;  %v344_v53 = vadd.f32 %v1271_v31, %v110_v37  ;;  %v100_v56 = vpop.permute.xlu2 %99 }
  0xe9   :  { %v403_v31 = vadd.f32 %v1265_v22, %v100_v56  ;;  %v454_v32 = vmax.f32 %v409_v54, 0.0  ;;  %v479_v22 = vld [vmem:[%s1322_s3] sm:$0xff] }
  0xea   :  { %v458_v55 = vmax.f32 %v415_v45, 0.0 }
  0xee   :  { %v352_v57 = vpop.f32.mrf.mxu0 }
  0xef   :  { %v417_v58 = vpop.f32.mrf.mxu1  ;;  %v353_v38 = vadd.f32 %v352_v57, %v125_v8  ;;  %v457_v57 = vmax.f32 %v350_v44, 0.0 }
  0xf0   :  { %v418_v41 = vadd.f32 %v417_v58, %v125_v8  ;;  %v341_v58 = vadd.f32 %v1267_v25, %v105_v52  ;;  %v486_v8 = vld [vmem:[%s1322_s3 + $0x38] sm:$0xff] }
  0xf1   :  { %v459_v50 = vmax.f32 %v353_v38, 0.0 }
  0xf2   :  { %v460_v51 = vmax.f32 %v418_v41, 0.0  ;;  %v451_v25 = vmax.f32 %v341_v58, 0.0 }
  0xf6   :  { %v355_v59 = vpop.f32.mrf.mxu0 }
  0xf7   :  { %v420_v60 = vpop.f32.mrf.mxu1  ;;  %v356_v33 = vadd.f32 %v355_v59, %v130_v7  ;;  %v455_v59 = vmax.f32 %v347_v48, 0.0 }
  0xf8   :  { %v421_v34 = vadd.f32 %v420_v60, %v130_v7  ;;  %v95_v60 = vpop.permute.xlu0 %94  ;;  %v485_v7 = vld [vmem:[%s1322_s3 + $0x30] sm:$0xff] }
  0xf9   :  { %v461_v46 = vmax.f32 %v356_v33, 0.0 }
  0xfa   :  { %v462_v47 = vmax.f32 %v421_v34, 0.0 }
  0xfe   :  { %v358_v62 = vpop.f32.mrf.mxu0 }
  0xff   :  { %v423_v63 = vpop.f32.mrf.mxu1  ;;  %v359_v24 = vadd.f32 %v358_v62, %v135_v6  ;;  %v453_v62 = vmax.f32 %v344_v53, 0.0 }
 0x100   :  { %v424_v27 = vadd.f32 %v423_v63, %v135_v6  ;;  %v335_v63 = vadd.f32 %v1259_v17, %v95_v60  ;;  %v480_v17 = vld [vmem:[%s1322_s3 + $0x8] sm:$0xff] }
 0x101   :  { %v463_v42 = vmax.f32 %v359_v24, 0.0  ;;  %v484_v6 = vld [vmem:[%s1322_s3 + $0x28] sm:$0xff] }
 0x102   :  { %v464_v43 = vmax.f32 %v424_v27, 0.0 }
 0x106   :  { %v361_v0 = vpop.f32.mrf.mxu0 }
 0x107   :  { %v426_v1 = vpop.f32.mrf.mxu1  ;;  %v362_v15 = vadd.f32 %v361_v0, %v140_v3  ;;  %v400_v0 = vadd.f32 %v1261_v18, %v95_v60  ;;  %v481_v18 = vld [vmem:[%s1322_s3 + $0x10] sm:$0xff] }
 0x108   :  { %v427_v16 = vadd.f32 %v426_v1, %v140_v3  ;;  %v452_v1 = vmax.f32 %v406_v39, 0.0  ;;  %v447_v3 = vmax.f32 %v335_v63, 0.0 }
 0x109   :  { %v465_v35 = vmax.f32 %v362_v15, 0.0  ;;  %v508_v15 = vpop.permute.xlu0 %507 }
 0x10a   :  { %v466_v36 = vmax.f32 %v427_v16, 0.0 }
 0x10e   :  { %v364_v4 = vpop.f32.mrf.mxu0 }
 0x10f   :  { %v429_v5 = vpop.f32.mrf.mxu1  ;;  %v365_v11 = vadd.f32 %v364_v4, %v145_v2  ;;  %v482_v4 = vld [vmem:[%s1322_s3 + $0x18] sm:$0xff] }
 0x110   :  { %v430_v12 = vadd.f32 %v429_v5, %v145_v2  ;;  %v450_v2 = vmax.f32 %v403_v31, 0.0  ;;  %v483_v5 = vld [vmem:[%s1322_s3 + $0x20] sm:$0xff] }
 0x111   :  { %v467_v28 = vmax.f32 %v365_v11, 0.0 }
 0x112   :  { %v468_v29 = vmax.f32 %v430_v12, 0.0 }
 0x116   :  { %v367_v9 = vpop.f32.mrf.mxu0 }
 0x117   :  { %v432_v10 = vpop.f32.mrf.mxu1  ;;  %v368_v13 = vadd.f32 %v367_v9, %v150_v61 }
 0x118   :  { %v433_v14 = vadd.f32 %v432_v10, %v150_v61  ;;  %v338_v61 = vadd.f32 %v1263_v21, %v100_v56  ;;  %v448_v21 = vmax.f32 %v400_v0, 0.0 }
 0x119   :  { %v469_v19 = vmax.f32 %v368_v13, 0.0  ;;  %v498_v13 = vpop.permute.xlu1 %497 }
 0x11a   :  { %v470_v20 = vmax.f32 %v433_v14, 0.0  ;;  %v449_v26 = vmax.f32 %v338_v61, 0.0  ;;  %v503_v14 = vpop.permute.xlu2 %502 }
 0x11b   :  { %539 = vmatpush.msrb.mxu2 %v469_v19 }
 0x11c   :  { %580 = vmatpush.msrb.mxu3 %v470_v20 }
 0x11d   :  { %540 = vmatpush.msrb.mxu2 %v467_v28  ;;  %v649_v28 = vpop.permute.xlu0 %648 }
 0x11e   :  { %581 = vmatpush.msrb.mxu3 %v468_v29 }
 0x11f   :  { %541 = vmatpush.msrb.mxu2 %v465_v35 }
 0x120   :  { %582 = vmatpush.msrb.mxu3 %v466_v36 }
 0x121   :  { %542 = vmatpush.msrb.mxu2 %v463_v42  ;;  %v513_v20 = vpop.permute.xlu1 %512 }
 0x122   :  { %583 = vmatpush.msrb.mxu3 %v464_v43  ;;  %v644_v23 = vpop.permute.xlu2 %643 }
 0x123   :  { %543 = vmatpush.msrb.mxu2 %v461_v46 }
 0x124   :  { %584 = vmatpush.msrb.mxu3 %v462_v47 }
 0x125   :  { %544 = vmatpush.msrb.mxu2 %v459_v50  ;;  %v523_v35 = vpop.permute.xlu0 %522 }
 0x126   :  { %585 = vmatpush.msrb.mxu3 %v460_v51 }
 0x127   :  { %545 = vmatpush.msrb.mxu2 %v457_v57 }
 0x128   :  { %586 = vmatpush.msrb.mxu3 %v458_v55 }
 0x129   :  { %546 = vmatpush.msrb.mxu2 %v455_v59  ;;  %v518_v29 = vpop.permute.xlu1 %517 }
 0x12a   :  { %587 = vmatpush.msrb.mxu3 %v456_v40  ;;  %v654_v34 = vpop.permute.xlu2 %653 }
 0x12b   :  { %547 = vmatpush.msrb.mxu2 %v453_v62 }
 0x12c   :  { %588 = vmatpush.msrb.mxu3 %v454_v32 }
 0x12d   :  { %548 = vmatpush.msrb.mxu2 %v451_v25  ;;  %v664_v58 = vpop.permute.xlu0 %663 }
 0x12e   :  { %589 = vmatpush.msrb.mxu3 %v452_v1 }
 0x12f   :  { %549 = vmatpush.msrb.mxu2 %v449_v26 }
 0x130   :  { %590 = vmatpush.msrb.mxu3 %v450_v2 }
 0x131   :  { %550 = vmatpush.msrb.mxu2 %v447_v3  ;;  %v659_v38 = vpop.permute.xlu1 %658 }
 0x132   :  { %591 = vmatpush.msrb.mxu3 %v448_v21  ;;  %551 = vmatmul.f32.vlgmr.msrb.gmra.mxu2 %v479_v22  ;;  %v528_v53 = vpop.permute.xlu2 %527 }
 0x133   :  { %592 = vmatmul.f32.vlgmr.msrb.gmra.mxu3 %v479_v22 }
 0x139   :  { %v533_v22 = vpop.permute.xlu1 %532 }
 0x13a   :  { %554 = vmatmul.f32.gmra.mxu2 %v480_v17 }
 0x13b   :  { %595 = vmatmul.f32.gmra.mxu3 %v480_v17 }
 0x142   :  { %557 = vmatmul.f32.gmra.mxu2 %v481_v18 }
 0x143   :  { %598 = vmatmul.f32.gmra.mxu3 %v481_v18 }
 0x14a   :  { %560 = vmatmul.f32.gmra.mxu2 %v482_v4 }
 0x14b   :  { %601 = vmatmul.f32.gmra.mxu3 %v482_v4 }
 0x152   :  { %563 = vmatmul.f32.gmra.mxu2 %v483_v5 }
 0x153   :  { %604 = vmatmul.f32.gmra.mxu3 %v483_v5 }
 0x15a   :  { %566 = vmatmul.f32.gmra.mxu2 %v484_v6 }
 0x15b   :  { %607 = vmatmul.f32.gmra.mxu3 %v484_v6 }
 0x162   :  { %569 = vmatmul.f32.gmra.mxu2 %v485_v7 }
 0x163   :  { %610 = vmatmul.f32.gmra.mxu3 %v485_v7 }
 0x16a   :  { %572 = vmatmul.f32.gmra.mxu2 %v486_v8 }
 0x16b   :  { %613 = vmatmul.f32.gmra.mxu3 %v486_v8 }
 0x1b5   :  { %v552_v9 = vpop.f32.mrf.mxu2 }
 0x1b6   :  { %v593_v10 = vpop.f32.mrf.mxu3  ;;  %v553_v41 = vadd.f32 %v552_v9, %v498_v13 }
 0x1b7   :  { %v594_v42 = vadd.f32 %v593_v10, %v498_v13 }
 0x1b8   :  { %v617_v51 = vmax.f32 %v553_v41, 0.0 }
 0x1b9   :  { %v618_v52 = vmax.f32 %v594_v42, 0.0  ;;  %v679_v42 = vpop.permute.xlu1 %678 }
 0x1ba   :  { %v681_v61 = vmul.f32 %v644_v23, %v617_v51 }
 0x1bb   :  { %v682_v31 = vmul.f32 %v644_v23, %v618_v52 }
 0x1bd   :  { %v555_v11 = vpop.f32.mrf.mxu2 }
 0x1be   :  { %v596_v12 = vpop.f32.mrf.mxu3  ;;  %v556_v36 = vadd.f32 %v555_v11, %v503_v14 }
 0x1bf   :  { %v597_v37 = vadd.f32 %v596_v12, %v503_v14  ;;  %v669_v14 = vpop.permute.xlu2 %668 }
 0x1c0   :  { %v619_v47 = vmax.f32 %v556_v36, 0.0 }
 0x1c1   :  { %v620_v48 = vmax.f32 %v597_v37, 0.0 }
 0x1c2   :  { %v683_v39 = vmul.f32 %v649_v28, %v619_v47 }
 0x1c3   :  { %v684_v59 = vmul.f32 %v649_v28, %v620_v48 }
 0x1c4   :  { %v697_v17 = vadd.f32 %v683_v39, %v681_v61  ;;  %v724_v39 = vstv %s1325_s6 }
 0x1c5   :  { %v558_v16 = vpop.f32.mrf.mxu2  ;;  %v710_v18 = vadd.f32 %v684_v59, %v682_v31 }
 0x1c6   :  { %v599_v19 = vpop.f32.mrf.mxu3  ;;  %v559_v43 = vadd.f32 %v558_v16, %v508_v15 }
 0x1c7   :  { %v600_v44 = vadd.f32 %v599_v19, %v508_v15  ;;  %v674_v19 = vpop.permute.xlu0 %673 }
 0x1c8   :  { %v621_v54 = vmax.f32 %v559_v43, 0.0 }
 0x1c9   :  { %v622_v57 = vmax.f32 %v600_v44, 0.0 }
 0x1ca   :  { %v685_v63 = vmul.f32 %v654_v34, %v621_v54 }
 0x1cb   :  { %v686_v0 = vmul.f32 %v654_v34, %v622_v57 }
 0x1cc   :  { %v698_v8 = vadd.f32 %v697_v17, %v685_v63 }
 0x1cd   :  { %v561_v24 = vpop.f32.mrf.mxu2  ;;  %v711_v9 = vadd.f32 %v710_v18, %v686_v0 }
 0x1ce   :  { %v602_v27 = vpop.f32.mrf.mxu3  ;;  %v562_v49 = vadd.f32 %v561_v24, %v513_v20 }
 0x1cf   :  { %v603_v50 = vadd.f32 %v602_v27, %v513_v20 }
 0x1d0   :  { %v623_v40 = vmax.f32 %v562_v49, 0.0 }
 0x1d1   :  { %v624_v60 = vmax.f32 %v603_v50, 0.0 }
 0x1d2   :  { %v687_v4 = vmul.f32 %v659_v38, %v623_v40 }
 0x1d3   :  { %v688_v5 = vmul.f32 %v659_v38, %v624_v60  ;;  %v733_v60 = vlaneseq }
 0x1d4   :  { %v699_v15 = vadd.f32 %v698_v8, %v687_v4 }
 0x1d5   :  { %v564_v30 = vpop.f32.mrf.mxu2  ;;  %v712_v16 = vadd.f32 %v711_v9, %v688_v5  ;;  %vm735_vm2 = vcmp.lt.s32.totalorder %v733_v60, 256 }
 0x1d6   :  { %v605_v33 = vpop.f32.mrf.mxu3  ;;  %v565_v55 = vadd.f32 %v564_v30, %v518_v29 }
 0x1d7   :  { %v606_v56 = vadd.f32 %v605_v33, %v518_v29 }
 0x1d8   :  { %v625_v25 = vmax.f32 %v565_v55, 0.0 }
 0x1d9   :  { %v626_v1 = vmax.f32 %v606_v56, 0.0 }
 0x1da   :  { %v689_v10 = vmul.f32 %v664_v58, %v625_v25 }
 0x1db   :  { %v690_v11 = vmul.f32 %v664_v58, %v626_v1 }
 0x1dc   :  { %v700_v24 = vadd.f32 %v699_v15, %v689_v10 }
 0x1dd   :  { %v567_v45 = vpop.f32.mrf.mxu2  ;;  %v713_v27 = vadd.f32 %v712_v16, %v690_v11 }
 0x1de   :  { %v608_v46 = vpop.f32.mrf.mxu3  ;;  %v568_v62 = vadd.f32 %v567_v45, %v523_v35 }
 0x1df   :  { %v609_v32 = vadd.f32 %v608_v46, %v523_v35 }
 0x1e0   :  { %v627_v6 = vmax.f32 %v568_v62, 0.0 }
 0x1e1   :  { %v628_v7 = vmax.f32 %v609_v32, 0.0 }
 0x1e2   :  { %v691_v20 = vmul.f32 %v669_v14, %v627_v6 }
 0x1e3   :  { %v692_v23 = vmul.f32 %v669_v14, %v628_v7 }
 0x1e4   :  { %v701_v36 = vadd.f32 %v700_v24, %v691_v20 }
 0x1e5   :  { %v570_v26 = vpop.f32.mrf.mxu2  ;;  %v714_v37 = vadd.f32 %v713_v27, %v692_v23 }
 0x1e6   :  { %v611_v2 = vpop.f32.mrf.mxu3  ;;  %v571_v3 = vadd.f32 %v570_v26, %v528_v53 }
 0x1e7   :  { %v612_v21 = vadd.f32 %v611_v2, %v528_v53 }
 0x1e8   :  { %v629_v12 = vmax.f32 %v571_v3, 0.0 }
 0x1e9   :  { %v630_v13 = vmax.f32 %v612_v21, 0.0 }
 0x1ea   :  { %v693_v30 = vmul.f32 %v674_v19, %v629_v12 }
 0x1eb   :  { %v694_v33 = vmul.f32 %v674_v19, %v630_v13 }
 0x1ec   :  { %v702_v43 = vadd.f32 %v701_v36, %v693_v30 }
 0x1ed   :  { %v573_v28 = vpop.f32.mrf.mxu2  ;;  %v715_v44 = vadd.f32 %v714_v37, %v694_v33 }
 0x1ee   :  { %v614_v29 = vpop.f32.mrf.mxu3  ;;  %v574_v34 = vadd.f32 %v573_v28, %v533_v22 }
 0x1ef   :  { %v615_v35 = vadd.f32 %v614_v29, %v533_v22 }
 0x1f0   :  { %v631_v38 = vmax.f32 %v574_v34, 0.0 }
 0x1f1   :  { %v632_v41 = vmax.f32 %v615_v35, 0.0 }
 0x1f2   :  { %v695_v45 = vmul.f32 %v679_v42, %v631_v38 }
 0x1f3   :  { %v696_v46 = vmul.f32 %v679_v42, %v632_v41 }
 0x1f4   :  { %v703_v47 = vadd.f32 %v702_v43, %v695_v45 }
 0x1f5   :  { %v716_v48 = vadd.f32 %v715_v44, %v696_v46 }
 0x1f6   :  { %v704_v49 = vrot.slane %v703_v47, 4 }
 0x1f7   :  { %v717_v50 = vrot.slane %v716_v48, 4 }
 0x1f8   :  { %v705_v51 = vadd.f32 %v704_v49, %v703_v47 }
 0x1f9   :  { %v718_v52 = vadd.f32 %v717_v50, %v716_v48 }
 0x1fa   :  { %v706_v53 = vrot.slane %v705_v51, 2 }
 0x1fb   :  { %v719_v54 = vrot.slane %v718_v52, 2 }
 0x1fc   :  { %v707_v57 = vadd.f32 %v706_v53, %v705_v51 }
 0x1fd   :  { %v720_v55 = vadd.f32 %v719_v54, %v718_v52 }
 0x1fe   :  { %v708_v56 = vrot.slane %v707_v57, 1 }
 0x1ff   :  { %v721_v58 = vrot.slane %v720_v55, 1 }
 0x200   :  { %v709_v59 = vadd.f32 %v708_v56, %v707_v57 }
 0x201   :  { %v722_v40 = vadd.f32 %v721_v58, %v720_v55 }
 0x202   :  { %v725_v31 = vadd.f32 %v724_v39, %v709_v59 }
 0x203   :  { %v726_v61 = vadd.f32 %v724_v39, %v722_v40 }
 0x205   :  { %v729_v62 = vrot.slane %v726_v61, 7 }
 0x207   :  { %v731_v32 = vsel %vm730_vm1, %v725_v31, %v729_v62 }
 0x208   :  { %737 = vst.msk [vmem:[#allocation3] sm:$0x3] %vm735_vm2, %v731_v32 }
 0x209   :  { %741 = vsyncadd [#allocation4], 16  ;;  %s745_s9 = sshll.u32 %s1326_s7, 4  ;;  %s882_s10 = smov [#allocation3]   ;;  %s746_s9 = int_to_ptr.hbm [resolvable:$true] %s745_s9 }
 0x20a   :  { %s743_s11 = sshll.u32 %s882_s10, 4  ;;  %s744_s11 = int_to_ptr.vmem [resolvable:$true] %s743_s11 }
 0x20b   :  { %748 = dma.vmem_to_hbm [thread:$0]  %s744_s11, 16, %s746_s9, [#allocation4]  }
 0x20c   :  { %879 = dma.done.wait [#allocation4], 32  }
 0x20d   :  { %880 = vsyncadd [#allocation4], 4294967264 }
 0x20e   :  { %753 = vsyncpa [#allocation4], 1 }

</bundles_post_ra>
